<compile_context>
chip_gen: v7x
topology: tpu7x:2x2x1
jax: 0.10.0
libtpu: 0.0.40
codegen_flags: <defaults>
</compile_context>

<pallas_src>
import numpy as np
import jax
import jax.numpy as jnp
from jax.experimental import pallas as pl
from jax.experimental.pallas import tpu as pltpu


def _make_unit_kernel(H, W, C):
    P = H * W

    def kernel(x_ref, p_ref, o_ref):
        NB = x_ref.shape[0]

        # Pass-through half -> even output channels: straight ref->ref copy,
        # lane-aligned dense store, no dtype round-trip.
        o_ref[:, :, :P] = x_ref[:, C:, :]

        pbuf = p_ref[...]                                # (10C, P) f32, 1 DMA
        misc = pbuf[9 * C:, :]                           # (C, P) small params
        w1 = misc[:, 0:C]                                # (C, C)
        w3 = misc[:, C:2 * C]                            # (C, C)
        b1 = misc[:, 2 * C:2 * C + 1]                    # (C, 1)
        b2 = misc[:, 2 * C + 1:2 * C + 2]                # (C, 1)
        b3 = misc[:, 2 * C + 2:2 * C + 3]                # (C, 1)
        # Per-tap masked depthwise weight planes (weight * border validity).
        wplanes = [pbuf[k * C:(k + 1) * C, :] for k in range(9)]

        hi = jax.lax.Precision.HIGHEST
        for b in range(NB):                              # NB <= ~4, unrolled
            res = x_ref[b, :C, :].astype(jnp.float32)    # (C, P)

            # ---- block 0: 1x1 conv (MXU) + bias + ReLU ----------------------
            y = jnp.dot(w1, res, preferred_element_type=jnp.float32,
                        precision=hi)
            y = jnp.maximum(y + b1, 0.0)

            # ---- block 1: depthwise 3x3, stride=1, pad=1 + bias + ReLU ------
            # Taps via XLU rolls along the flattened-spatial lane axis; image
            # borders handled by the pre-masked weight planes. (Correct only
            # for k=3 / pad=1 / stride=1: every wrapped tap position is also
            # a masked border position.)
            acc = None
            k = 0
            for di in (-1, 0, 1):
                for dj in (-1, 0, 1):
                    s = di * W + dj
                    if di == 0 and dj == 0:
                        tap = y
                    else:
                        tap = pltpu.roll(y, (-s) % P, axis=1)
                    term = wplanes[k] * tap
                    acc = term if acc is None else acc + term
                    k += 1
            y = jnp.maximum(acc + b2, 0.0)

            # ---- block 2: 1x1 conv (MXU) + bias + ReLU ----------------------
            z = jnp.dot(w3, y, preferred_element_type=jnp.float32,
                        precision=hi)
            z = jnp.maximum(z + b3, 0.0)

            # Residual half -> odd output channels (lane-aligned dense store).
            o_ref[b, :, P:] = z.astype(o_ref.dtype)

    return kernel


def mobile_shuffle_unit_pallas(x_nchw, params, *, batch_blocks=1):
    """x_nchw: (N, 2*C, H, W) PyTorch layout. Returns (N, 2*C, H, W).

    On v7x pass batch_blocks=2 (even N) so both TensorCores get a grid step;
    on v5e/v6e keep the default single step.
    """
    w1, b1, dw, b2, w3, b3 = params
    N, C2, H, W = x_nchw.shape
    C = C2 // 2
    P = H * W
    assert C2 == 2 * C
    assert H >= 2 and W >= 2
    assert N % batch_blocks == 0
    NB = N // batch_blocks
    # Keep NB small so the unrolled per-batch pipeline stays in the vreg file;
    # raise batch_blocks (more grid steps) instead of widening the block.
    assert NB <= 8, "cap NB; raise batch_blocks for larger N"
    assert P >= 2 * C + 3, "packed misc params must fit in one lane row"

    # ---- static parameter folding (wrapper-side; in a real deployment this
    # is precomputed once since the reparam weights are frozen) --------------
    w1_k = w1[:, :, 0, 0].astype(jnp.float32)           # (C_out, C_in)
    w3_k = w3[:, :, 0, 0].astype(jnp.float32)
    dw_k = dw[:, 0].reshape(C, 9).astype(jnp.float32)   # (C, 1, 3, 3) -> (C, 9)

    # Per-tap border-validity masks over the flattened spatial axis (static).
    pos = np.arange(P)
    hh, ww = pos // W, pos % W
    planes = []
    for di in (-1, 0, 1):
        for dj in (-1, 0, 1):
            valid = ((hh + di >= 0) & (hh + di < H) &
                     (ww + dj >= 0) & (ww + dj < W))
            planes.append(valid.astype(np.float32))
    mask_planes = jnp.asarray(np.stack(planes, 0))       # (9, P)

    # wplane[k, c, p] = dw[c, k] * mask_k[p]  -> flattened to (9*C, P)
    wplane = (dw_k.T[:, :, None] * mask_planes[:, None, :]).reshape(9 * C, P)

    misc = jnp.zeros((C, P), jnp.float32)
    misc = misc.at[:, 0:C].set(w1_k)
    misc = misc.at[:, C:2 * C].set(w3_k)
    misc = misc.at[:, 2 * C].set(b1.astype(jnp.float32))
    misc = misc.at[:, 2 * C + 1].set(b2.astype(jnp.float32))
    misc = misc.at[:, 2 * C + 2].set(b3.astype(jnp.float32))
    packed = jnp.concatenate([wplane, misc], axis=0)     # (10C, P): one DMA

    # Free (contiguous) reshape only -- no transposes.
    x_flat = x_nchw.reshape(N, C2, P)
    kernel = _make_unit_kernel(H, W, C)

    out = pl.pallas_call(
        kernel,
        out_shape=jax.ShapeDtypeStruct((N, C, 2 * P), x_nchw.dtype),
        grid=(batch_blocks,),
        in_specs=[
            pl.BlockSpec((NB, C2, P), lambda i: (i, 0, 0)),
            pl.BlockSpec((10 * C, P), lambda i: (0, 0)),
        ],
        out_specs=pl.BlockSpec((NB, C, 2 * P), lambda i: (i, 0, 0)),
        compiler_params=pltpu.CompilerParams(
            dimension_semantics=("parallel",)),
    )(x_flat, packed)

    # out[n, c, g*P + p] -> channel 2c+g : contiguous merge == channel shuffle.
    return out.reshape(N, 2 * C, H, W)


def reference(x_nchw, params):
    """Pure-JAX reference mirroring the PyTorch forward."""
    w1, b1, dw, b2, w3, b3 = params
    C = x_nchw.shape[1] // 2
    res, sc = x_nchw[:, :C], x_nchw[:, C:]

    def conv(x, w, b, groups, pad):
        y = jax.lax.conv_general_dilated(
            x, w, window_strides=(1, 1),
            padding=[(pad, pad), (pad, pad)],
            feature_group_count=groups,
            dimension_numbers=('NCHW', 'OIHW', 'NCHW'),
            precision=jax.lax.Precision.HIGHEST)
        return jax.nn.relu(y + b.reshape(1, -1, 1, 1))

    r = conv(res, w1, b1, 1, 0)
    r = conv(r, dw, b2, C, 1)
    r = conv(r, w3, b3, 1, 0)
    cat = jnp.concatenate([sc, r], axis=1)
    N, C2, H, W = cat.shape
    return (cat.reshape(N, 2, C2 // 2, H, W)
               .transpose(0, 2, 1, 3, 4)
               .reshape(N, C2, H, W))


if __name__ == "__main__":
    key = jax.random.PRNGKey(0)
    C = 8                     # MobileShuffleUnit(channels=8, stride=1, 1, False, True)
    N, H, W = 2, 16, 16       # H*W = 256 -> lane-dense (multiple of 128)
    ks = jax.random.split(key, 7)
    x = jax.random.normal(ks[0], (N, 2 * C, H, W), jnp.float32)
    w1 = jax.random.normal(ks[1], (C, C, 1, 1), jnp.float32) * 0.3   # block0 reparam conv
    b1 = jax.random.normal(ks[2], (C,), jnp.float32) * 0.1
    dw = jax.random.normal(ks[3], (C, 1, 3, 3), jnp.float32) * 0.3   # block1 depthwise conv
    b2 = jax.random.normal(ks[4], (C,), jnp.float32) * 0.1
    w3 = jax.random.normal(ks[5], (C, C, 1, 1), jnp.float32) * 0.3   # block2 reparam conv
    b3 = jax.random.normal(ks[6], (C,), jnp.float32) * 0.1
    params = (w1, b1, dw, b2, w3, b3)

    fn = jax.jit(mobile_shuffle_unit_pallas)
    out = jax.block_until_ready(fn(x, params))

    ref = reference(x, params)
    assert out.shape == (N, 2 * C, H, W)
    err = float(jnp.max(jnp.abs(out - ref)))
    assert jnp.allclose(out, ref, atol=1e-3, rtol=1e-3), f"max abs err {err}"
    print("KERNEL_OK")
</pallas_src>

<mosaic_0001>
module attributes {stable_mosaic.version = 11 : i64} {
  func.func @kernel(%arg0: i32, %arg1: memref<2x16x256xf32, #tpu.memory_space<vmem>>, %arg2: memref<80x256xf32, #tpu.memory_space<vmem>>, %arg3: memref<2x8x512xf32, #tpu.memory_space<vmem>>) attributes {dimension_semantics = [#tpu.dimension_semantics<parallel>], iteration_bounds = array<i64: 1>, scalar_prefetch = 0 : i64, scratch_operands = 0 : i64, tpu.core_type = #tpu.core_type<tc>, window_params = [{transform_indices = @transform_0, window_bounds = array<i64: 2, 16, 256>}, {pipeline_mode = #tpu.pipeline_mode<synchronous>, transform_indices = @transform_1, window_bounds = array<i64: 80, 256>}, {transform_indices = @transform_2, window_bounds = array<i64: 2, 8, 512>}]} {
    %c0 = arith.constant 0 : index
    %c8 = arith.constant 8 : index
    %c0_0 = arith.constant 0 : index
    %0 = vector.load %arg1[%c0, %c8, %c0_0] : memref<2x16x256xf32, #tpu.memory_space<vmem>>, vector<2x8x256xf32>
    %c0_1 = arith.constant 0 : index
    %c0_2 = arith.constant 0 : index
    %c0_3 = arith.constant 0 : index
    %1 = vector.load %arg3[%c0_1, %c0_2, %c0_3] : memref<2x8x512xf32, #tpu.memory_space<vmem>>, vector<2x8x256xf32>
    tpu.vector_store %arg3[%c0_1, %c0_2, %c0_3], %0 {strides = array<i32>} : memref<2x8x512xf32, #tpu.memory_space<vmem>>, vector<2x8x256xf32>,
    %c0_4 = arith.constant 0 : index
    %c0_5 = arith.constant 0 : index
    %2 = vector.load %arg2[%c0_4, %c0_5] : memref<80x256xf32, #tpu.memory_space<vmem>>, vector<80x256xf32>
    %3 = vector.extract_strided_slice %2 {offsets = [72, 0], sizes = [8, 256], strides = [1, 1]} : vector<80x256xf32> to vector<8x256xf32>
    %4 = vector.extract_strided_slice %3 {offsets = [0, 0], sizes = [8, 8], strides = [1, 1]} : vector<8x256xf32> to vector<8x8xf32>
    %5 = vector.extract_strided_slice %3 {offsets = [0, 8], sizes = [8, 8], strides = [1, 1]} : vector<8x256xf32> to vector<8x8xf32>
    %6 = vector.extract_strided_slice %3 {offsets = [0, 16], sizes = [8, 1], strides = [1, 1]} : vector<8x256xf32> to vector<8x1xf32>
    %7 = vector.extract_strided_slice %3 {offsets = [0, 17], sizes = [8, 1], strides = [1, 1]} : vector<8x256xf32> to vector<8x1xf32>
    %8 = vector.extract_strided_slice %3 {offsets = [0, 18], sizes = [8, 1], strides = [1, 1]} : vector<8x256xf32> to vector<8x1xf32>
    %9 = vector.extract_strided_slice %2 {offsets = [0, 0], sizes = [8, 256], strides = [1, 1]} : vector<80x256xf32> to vector<8x256xf32>
    %10 = vector.extract_strided_slice %2 {offsets = [8, 0], sizes = [8, 256], strides = [1, 1]} : vector<80x256xf32> to vector<8x256xf32>
    %11 = vector.extract_strided_slice %2 {offsets = [16, 0], sizes = [8, 256], strides = [1, 1]} : vector<80x256xf32> to vector<8x256xf32>
    %12 = vector.extract_strided_slice %2 {offsets = [24, 0], sizes = [8, 256], strides = [1, 1]} : vector<80x256xf32> to vector<8x256xf32>
    %13 = vector.extract_strided_slice %2 {offsets = [32, 0], sizes = [8, 256], strides = [1, 1]} : vector<80x256xf32> to vector<8x256xf32>
    %14 = vector.extract_strided_slice %2 {offsets = [40, 0], sizes = [8, 256], strides = [1, 1]} : vector<80x256xf32> to vector<8x256xf32>
    %15 = vector.extract_strided_slice %2 {offsets = [48, 0], sizes = [8, 256], strides = [1, 1]} : vector<80x256xf32> to vector<8x256xf32>
    %16 = vector.extract_strided_slice %2 {offsets = [56, 0], sizes = [8, 256], strides = [1, 1]} : vector<80x256xf32> to vector<8x256xf32>
    %17 = vector.extract_strided_slice %2 {offsets = [64, 0], sizes = [8, 256], strides = [1, 1]} : vector<80x256xf32> to vector<8x256xf32>
    %c0_6 = arith.constant 0 : index
    %c0_7 = arith.constant 0 : index
    %c0_8 = arith.constant 0 : index
    %18 = vector.load %arg1[%c0_6, %c0_7, %c0_8] : memref<2x16x256xf32, #tpu.memory_space<vmem>>, vector<1x8x256xf32>
    %19 = vector.shape_cast %18 : vector<1x8x256xf32> to vector<8x256xf32>
    %cst = arith.constant dense<0.000000e+00> : vector<8x256xf32>
    %20 = tpu.matmul %4, %19, %cst {dimension_numbers = #tpu.dot_dimension_numbers<[1], [0], [0], [1], [0, 0, 1, 1], [], []>, precision = #tpu.contract_precision<fp32>} : vector<8x8xf32>, vector<8x256xf32>, vector<8x256xf32> -> vector<8x256xf32>
    %21 = vector.broadcast %6 : vector<8x1xf32> to vector<8x256xf32>
    %22 = arith.addf %20, %21 : vector<8x256xf32>
    %cst_9 = arith.constant 0.000000e+00 : f32
    %23 = vector.broadcast %cst_9 : f32 to vector<8x256xf32>
    %24 = arith.maximumf %22, %23 : vector<8x256xf32>
    %c17_i32 = arith.constant 17 : i32
    %25 = tpu.dynamic_rotate %24 by %c17_i32 dim 1 : vector<8x256xf32>, i32 -> vector<8x256xf32>
    %26 = arith.mulf %9, %25 : vector<8x256xf32>
    %c16_i32 = arith.constant 16 : i32
    %27 = tpu.dynamic_rotate %24 by %c16_i32 dim 1 : vector<8x256xf32>, i32 -> vector<8x256xf32>
    %28 = arith.mulf %10, %27 : vector<8x256xf32>
    %29 = arith.addf %26, %28 : vector<8x256xf32>
    %c15_i32 = arith.constant 15 : i32
    %30 = tpu.dynamic_rotate %24 by %c15_i32 dim 1 : vector<8x256xf32>, i32 -> vector<8x256xf32>
    %31 = arith.mulf %11, %30 : vector<8x256xf32>
    %32 = arith.addf %29, %31 : vector<8x256xf32>
    %c1_i32 = arith.constant 1 : i32
    %33 = tpu.dynamic_rotate %24 by %c1_i32 dim 1 : vector<8x256xf32>, i32 -> vector<8x256xf32>
    %34 = arith.mulf %12, %33 : vector<8x256xf32>
    %35 = arith.addf %32, %34 : vector<8x256xf32>
    %36 = arith.mulf %13, %24 : vector<8x256xf32>
    %37 = arith.addf %35, %36 : vector<8x256xf32>
    %c255_i32 = arith.constant 255 : i32
    %38 = tpu.dynamic_rotate %24 by %c255_i32 dim 1 : vector<8x256xf32>, i32 -> vector<8x256xf32>
    %39 = arith.mulf %14, %38 : vector<8x256xf32>
    %40 = arith.addf %37, %39 : vector<8x256xf32>
    %c241_i32 = arith.constant 241 : i32
    %41 = tpu.dynamic_rotate %24 by %c241_i32 dim 1 : vector<8x256xf32>, i32 -> vector<8x256xf32>
    %42 = arith.mulf %15, %41 : vector<8x256xf32>
    %43 = arith.addf %40, %42 : vector<8x256xf32>
    %c240_i32 = arith.constant 240 : i32
    %44 = tpu.dynamic_rotate %24 by %c240_i32 dim 1 : vector<8x256xf32>, i32 -> vector<8x256xf32>
    %45 = arith.mulf %16, %44 : vector<8x256xf32>
    %46 = arith.addf %43, %45 : vector<8x256xf32>
    %c239_i32 = arith.constant 239 : i32
    %47 = tpu.dynamic_rotate %24 by %c239_i32 dim 1 : vector<8x256xf32>, i32 -> vector<8x256xf32>
    %48 = arith.mulf %17, %47 : vector<8x256xf32>
    %49 = arith.addf %46, %48 : vector<8x256xf32>
    %50 = vector.broadcast %7 : vector<8x1xf32> to vector<8x256xf32>
    %51 = arith.addf %49, %50 : vector<8x256xf32>
    %cst_10 = arith.constant 0.000000e+00 : f32
    %52 = vector.broadcast %cst_10 : f32 to vector<8x256xf32>
    %53 = arith.maximumf %51, %52 : vector<8x256xf32>
    %cst_11 = arith.constant dense<0.000000e+00> : vector<8x256xf32>
    %54 = tpu.matmul %5, %53, %cst_11 {dimension_numbers = #tpu.dot_dimension_numbers<[1], [0], [0], [1], [0, 0, 1, 1], [], []>, precision = #tpu.contract_precision<fp32>} : vector<8x8xf32>, vector<8x256xf32>, vector<8x256xf32> -> vector<8x256xf32>
    %55 = vector.broadcast %8 : vector<8x1xf32> to vector<8x256xf32>
    %56 = arith.addf %54, %55 : vector<8x256xf32>
    %cst_12 = arith.constant 0.000000e+00 : f32
    %57 = vector.broadcast %cst_12 : f32 to vector<8x256xf32>
    %58 = arith.maximumf %56, %57 : vector<8x256xf32>
    %c0_13 = arith.constant 0 : index
    %c0_14 = arith.constant 0 : index
    %c256 = arith.constant 256 : index
    %59 = vector.load %arg3[%c0_13, %c0_14, %c256] : memref<2x8x512xf32, #tpu.memory_space<vmem>>, vector<1x8x256xf32>
    %60 = vector.shape_cast %59 : vector<1x8x256xf32> to vector<8x256xf32>
    %61 = vector.shape_cast %58 : vector<8x256xf32> to vector<1x8x256xf32>
    tpu.vector_store %arg3[%c0_13, %c0_14, %c256], %61 {strides = array<i32>} : memref<2x8x512xf32, #tpu.memory_space<vmem>>, vector<1x8x256xf32>,
    %c1 = arith.constant 1 : index
    %c0_15 = arith.constant 0 : index
    %c0_16 = arith.constant 0 : index
    %62 = vector.load %arg1[%c1, %c0_15, %c0_16] : memref<2x16x256xf32, #tpu.memory_space<vmem>>, vector<1x8x256xf32>
    %63 = vector.shape_cast %62 : vector<1x8x256xf32> to vector<8x256xf32>
    %cst_17 = arith.constant dense<0.000000e+00> : vector<8x256xf32>
    %64 = tpu.matmul %4, %63, %cst_17 {dimension_numbers = #tpu.dot_dimension_numbers<[1], [0], [0], [1], [0, 0, 1, 1], [], []>, precision = #tpu.contract_precision<fp32>} : vector<8x8xf32>, vector<8x256xf32>, vector<8x256xf32> -> vector<8x256xf32>
    %65 = vector.broadcast %6 : vector<8x1xf32> to vector<8x256xf32>
    %66 = arith.addf %64, %65 : vector<8x256xf32>
    %cst_18 = arith.constant 0.000000e+00 : f32
    %67 = vector.broadcast %cst_18 : f32 to vector<8x256xf32>
    %68 = arith.maximumf %66, %67 : vector<8x256xf32>
    %c17_i32_19 = arith.constant 17 : i32
    %69 = tpu.dynamic_rotate %68 by %c17_i32_19 dim 1 : vector<8x256xf32>, i32 -> vector<8x256xf32>
    %70 = arith.mulf %9, %69 : vector<8x256xf32>
    %c16_i32_20 = arith.constant 16 : i32
    %71 = tpu.dynamic_rotate %68 by %c16_i32_20 dim 1 : vector<8x256xf32>, i32 -> vector<8x256xf32>
    %72 = arith.mulf %10, %71 : vector<8x256xf32>
    %73 = arith.addf %70, %72 : vector<8x256xf32>
    %c15_i32_21 = arith.constant 15 : i32
    %74 = tpu.dynamic_rotate %68 by %c15_i32_21 dim 1 : vector<8x256xf32>, i32 -> vector<8x256xf32>
    %75 = arith.mulf %11, %74 : vector<8x256xf32>
    %76 = arith.addf %73, %75 : vector<8x256xf32>
    %c1_i32_22 = arith.constant 1 : i32
    %77 = tpu.dynamic_rotate %68 by %c1_i32_22 dim 1 : vector<8x256xf32>, i32 -> vector<8x256xf32>
    %78 = arith.mulf %12, %77 : vector<8x256xf32>
    %79 = arith.addf %76, %78 : vector<8x256xf32>
    %80 = arith.mulf %13, %68 : vector<8x256xf32>
    %81 = arith.addf %79, %80 : vector<8x256xf32>
    %c255_i32_23 = arith.constant 255 : i32
    %82 = tpu.dynamic_rotate %68 by %c255_i32_23 dim 1 : vector<8x256xf32>, i32 -> vector<8x256xf32>
    %83 = arith.mulf %14, %82 : vector<8x256xf32>
    %84 = arith.addf %81, %83 : vector<8x256xf32>
    %c241_i32_24 = arith.constant 241 : i32
    %85 = tpu.dynamic_rotate %68 by %c241_i32_24 dim 1 : vector<8x256xf32>, i32 -> vector<8x256xf32>
    %86 = arith.mulf %15, %85 : vector<8x256xf32>
    %87 = arith.addf %84, %86 : vector<8x256xf32>
    %c240_i32_25 = arith.constant 240 : i32
    %88 = tpu.dynamic_rotate %68 by %c240_i32_25 dim 1 : vector<8x256xf32>, i32 -> vector<8x256xf32>
    %89 = arith.mulf %16, %88 : vector<8x256xf32>
    %90 = arith.addf %87, %89 : vector<8x256xf32>
    %c239_i32_26 = arith.constant 239 : i32
    %91 = tpu.dynamic_rotate %68 by %c239_i32_26 dim 1 : vector<8x256xf32>, i32 -> vector<8x256xf32>
    %92 = arith.mulf %17, %91 : vector<8x256xf32>
    %93 = arith.addf %90, %92 : vector<8x256xf32>
    %94 = vector.broadcast %7 : vector<8x1xf32> to vector<8x256xf32>
    %95 = arith.addf %93, %94 : vector<8x256xf32>
    %cst_27 = arith.constant 0.000000e+00 : f32
    %96 = vector.broadcast %cst_27 : f32 to vector<8x256xf32>
    %97 = arith.maximumf %95, %96 : vector<8x256xf32>
    %cst_28 = arith.constant dense<0.000000e+00> : vector<8x256xf32>
    %98 = tpu.matmul %5, %97, %cst_28 {dimension_numbers = #tpu.dot_dimension_numbers<[1], [0], [0], [1], [0, 0, 1, 1], [], []>, precision = #tpu.contract_precision<fp32>} : vector<8x8xf32>, vector<8x256xf32>, vector<8x256xf32> -> vector<8x256xf32>
    %99 = vector.broadcast %8 : vector<8x1xf32> to vector<8x256xf32>
    %100 = arith.addf %98, %99 : vector<8x256xf32>
    %cst_29 = arith.constant 0.000000e+00 : f32
    %101 = vector.broadcast %cst_29 : f32 to vector<8x256xf32>
    %102 = arith.maximumf %100, %101 : vector<8x256xf32>
    %c1_30 = arith.constant 1 : index
    %c0_31 = arith.constant 0 : index
    %c256_32 = arith.constant 256 : index
    %103 = vector.load %arg3[%c1_30, %c0_31, %c256_32] : memref<2x8x512xf32, #tpu.memory_space<vmem>>, vector<1x8x256xf32>
    %104 = vector.shape_cast %103 : vector<1x8x256xf32> to vector<8x256xf32>
    %105 = vector.shape_cast %102 : vector<8x256xf32> to vector<1x8x256xf32>
    tpu.vector_store %arg3[%c1_30, %c0_31, %c256_32], %105 {strides = array<i32>} : memref<2x8x512xf32, #tpu.memory_space<vmem>>, vector<1x8x256xf32>,
    return
  }
  func.func @transform_0(%arg0: i32) -> (i32, i32, i32) {
    %c0_i32 = arith.constant 0 : i32
    %c0_i32_0 = arith.constant 0 : i32
    %c0_i32_1 = arith.constant 0 : i32
    return %arg0, %c0_i32, %c0_i32_0 : i32, i32, i32
  }
  func.func @transform_1(%arg0: i32) -> (i32, i32) {
    %c0_i32 = arith.constant 0 : i32
    %c0_i32_0 = arith.constant 0 : i32
    %c0_i32_1 = arith.constant 0 : i32
    return %c0_i32, %c0_i32_0 : i32, i32
  }
  func.func @transform_2(%arg0: i32) -> (i32, i32, i32) {
    %c0_i32 = arith.constant 0 : i32
    %c0_i32_0 = arith.constant 0 : i32
    %c0_i32_1 = arith.constant 0 : i32
    return %arg0, %c0_i32, %c0_i32_0 : i32, i32, i32
  }
}

</mosaic_0001>

<bundles_post_ra>
// kernel: squeeze.5
= control target key start
LH: loop header
LB: loop body
LE: loop exit
PB: predicated region body
PF: predicated region fallthrough
CT: control target
= control target key end

     0   :  { %vm16_vm0 = vcmask 64512   ;;  %s61_s0 = inlined_call_operand.vmem [shape: f32[8,3,3], index: 0, kind: input, shape index: {}]   ;;  %s62_s1 = inlined_call_operand.vmem [shape: f32[8,9], index: 1, kind: output, shape index: {}]  }
   0x1   :  { %v29_v0 = vld [vmem:[%s61_s0 + $0x8] sm:$0xf]  ;;  %v30_v1 = vld [vmem:[%s61_s0 + $0x4] sm:$0xf]  ;;  %v13_v2 = vld [vmem:[%s61_s0] sm:$0xf] }
   0x2   :  { %8 = vst [vmem:[#allocation0 + $0x10] sm:$0xf] %v29_v0  ;;  %12 = vst [vmem:[#allocation0 + $0x8] sm:$0xf] %v30_v1 }
   0x3   :  { %14 = vst [vmem:[#allocation0] sm:$0xf] %v13_v2 }
   0x9   :  { %v19_v4 = vld [vmem:[#allocation0 + $0x8] sm:$0x7]   ;;  %v24_v5 = vld [vmem:[#allocation0 + $0x10] sm:$0x7]  }
   0xa   :  { %v15_v3 = vld [vmem:[#allocation0] sm:$0x7]   ;;  %31 = vst.msk [vmem:[%s62_s1 + $0x3] sm:$0x7] %vm16_vm0, %v19_v4   ;;  %32 = vst.msk [vmem:[%s62_s1 + $0x6] sm:$0x7] %vm16_vm0, %v24_v5  }
   0xb   :  { %17 = vst.msk [vmem:[%s62_s1] sm:$0x7] %vm16_vm0, %v15_v3  }

// kernel: mobile_shuffle_unit_pallas.1
= control target key start
LH: loop header
LB: loop body
LE: loop exit
PB: predicated region body
PF: predicated region fallthrough
CT: control target
= control target key end

     0   :  { %vm45_vm0 = vcmask 64512   ;;  %v2191_v2 = vmov 0.0   ;;  %v2192_v4 = vmov 16   ;;  %v2193_v33 = vmov 17   ;;  %s2194_s19 = smov 16   ;;  %s2195_s20 = smov 17   ;;  %s2644_s0 = inlined_call_operand.vmem [shape: f32[2,16,256], index: 0, kind: input, shape index: {}]   ;;  %s2645_s1 = inlined_call_operand.vmem [shape: f32[80,256], index: 1, kind: input, shape index: {}]   ;;  %s2646_s2 = inlined_call_operand.vmem [shape: f32[2,8,512], index: 2, kind: output, shape index: {}]  }
   0x1   :  { %v39_v0 = vld [vmem:[%s2644_s0 + $0x8] sm:$0xff]  ;;  %v38_v1 = vld [vmem:[%s2644_s0] sm:$0xff]  ;;  %114 = vmatprep.mubr.f32.mxu0 %v2191_v2  ;;  %v2229_v3 = vld [vmem:[%s2645_s1 + $0x90] sm:$0xff]  ;;  %2187 = vset.pattern.permute.xlu0 %v2192_v4  ;;  %s2196_s21 = smov 15   ;;  %s2197_s22 = smov 111   ;;  %v519_v51 = vlaneseq  ;;  %v2203_v61 = vmov 18  }
   0x2   :  { %v48_v5 = vand.u32 4294901760, %v39_v0  ;;  %v50_v6 = vand.u32 4294901760, %v38_v1  ;;  %v46_v7 = vsel %vm45_vm0, %v2229_v3, 0  ;;  %42 = vperm.xlu0 %2187, %v2229_v3   ;;  %689 = vmatprep.mubr.f32.mxu1 %v2191_v2  ;;  %v2123_v21 = vld [vmem:[%s2644_s0 + $0x28] sm:$0xff]  ;;  %v2122_v23 = vld [vmem:[%s2644_s0 + $0x20] sm:$0xff]  ;;  %s2198_s23 = smov 1  }
   0x3   :  { %v2235_v8 = vand.u32 4294901760, %v46_v7  ;;  %v1095_v22 = vand.u32 4294901760, %v2123_v21  ;;  %v1097_v24 = vand.u32 4294901760, %v2122_v23  ;;  %2188 = vset.pattern.permute.xlu1 %v2193_v33  ;;  %s2199_s24 = smov 127   ;;  %s2200_s25 = smov 113   ;;  %v2329_v54 = vand.u32 127, %v519_v51 }
   0x4   :  { %49 = vmatprep.subr.mxu0 %v48_v5  ;;  %v133_v9 = vsub.f32 %v38_v1, %v50_v6  ;;  %v127_v10 = vsub.f32 %v39_v0, %v48_v5  ;;  %s2201_s26 = smov 112   ;;  %s2202_s27 = smov 120   ;;  %v2338_v57 = vld [vmem:[%s2645_s1] sm:$0xff]  ;;  %v2343_v58 = vld [vmem:[%s2645_s1 + $0x8] sm:$0xff]  ;;  %v11_v62 = vld [vmem:[%s2644_s0 + $0x10] sm:$0xff] }
   0x5   :  { %51 = vmatpush1.msra.mxu0 %v50_v6  ;;  %v116_v11 = vsub.f32 %v46_v7, %v2235_v8  ;;  %v1174_v25 = vsub.f32 %v2123_v21, %v1095_v22  ;;  %v1180_v26 = vsub.f32 %v2122_v23, %v1097_v24  ;;  %vm521_vm1 = vcmp.lt.s32.totalorder %v2329_v54, 17  ;;  %v12_v63 = vld [vmem:[%s2644_s0 + $0x18] sm:$0xff]  ;;  %v13_v0 = vld [vmem:[%s2644_s0 + $0x30] sm:$0xff]  ;;  %15 = vst [vmem:[%s2646_s2] sm:$0xff] %v11_v62 }
   0x6   :  { %v128_v12 = vand.u32 4294901760, %v127_v10  ;;  %v134_v13 = vand.u32 4294901760, %v133_v9  ;;  %vm530_vm2 = vcmp.lt.s32.totalorder %v2329_v54, 16  ;;  %2190 = vset.pattern.permute.xlu0 %v2203_v61  ;;  %16 = vst [vmem:[%s2646_s2 + $0x8] sm:$0xff] %v12_v63  ;;  %17 = vst [vmem:[%s2646_s2 + $0x20] sm:$0xff] %v13_v0  ;;  %vm541_vm3 = vcmp.lt.s32.totalorder %v2329_v54, 15 }
   0x7   :  { %v117_v14 = vand.u32 4294901760, %v116_v11  ;;  %v1175_v27 = vand.u32 4294901760, %v1174_v25  ;;  %v1181_v28 = vand.u32 4294901760, %v1180_v26  ;;  %vm552_vm4 = vcmp.lt.s32.totalorder %v2329_v54, 1  ;;  %v2418_v23 = vld [vmem:[%s2645_s1 + $0x38] sm:$0xff]  ;;  %v2479_v62 = vld [vmem:[%s2645_s1 + $0x70] sm:$0xff] }
   0x8   :  { %v129_v15 = vsub.f32 %v127_v10, %v128_v12  ;;  %v135_v16 = vsub.f32 %v133_v9, %v134_v13  ;;  %vm567_vm5 = vcmp.lt.s32.totalorder %v2329_v54, 127  ;;  %vm578_vm6 = vcmp.lt.s32.totalorder %v2329_v54, 113  ;;  %v2484_v63 = vld [vmem:[%s2645_s1 + $0x78] sm:$0xff] }
   0x9   :  { %v118_v17 = vsub.f32 %v116_v11, %v117_v14  ;;  %v1176_v29 = vsub.f32 %v1174_v25, %v1175_v27  ;;  %v1182_v30 = vsub.f32 %v1180_v26, %v1181_v28  ;;  %vm589_vm7 = vcmp.lt.s32.totalorder %v2329_v54, 112 }
   0xa   :  { %v130_v18 = vand.u32 4294901760, %v129_v15  ;;  %v136_v19 = vand.u32 4294901760, %v135_v16  ;;  %v2401_v15 = vld [vmem:[%s2645_s1 + $0x28] sm:$0xff]  ;;  %vm600_vm8 = vcmp.lt.s32.totalorder %v2329_v54, 111 }
   0xb   :  { %v119_v20 = vand.u32 4294901760, %v118_v17  ;;  %v1177_v31 = vand.u32 4294901760, %v1176_v29  ;;  %v1183_v32 = vand.u32 4294901760, %v1182_v30 }
   0xc   :  { %131 = vmatprep.subr.mxu0 %v130_v18 }
   0xd   :  { %120 = vmatmul.mubr.f32.vlgmr.msra.gmra.mrb[0].mxu0 %v119_v20 }
   0xe   :  { %137 = vmatpush1.msra.mxu0 %v136_v19  ;;  %200 = vmatprep.mubr.f32.mxu0 %v2191_v2 }
   0xf   :  { %210 = vmatprep.subr.mxu0 %v127_v10 }
  0x15   :  { %202 = vmatmul.mubr.f32.vlgmr.msra.gmra.mrb[0].mxu0 %v2235_v8 }
  0x16   :  { %213 = vmatpush1.msra.mxu0 %v133_v9  ;;  %276 = vmatprep.mubr.f32.mxu0 %v2191_v2 }
  0x17   :  { %286 = vmatprep.subr.mxu0 %v48_v5 }
  0x1d   :  { %279 = vmatmul.mubr.f32.vlgmr.msra.gmra.mrb[0].mxu0 %v116_v11 }
  0x1e   :  { %288 = vmatpush1.msra.mxu0 %v50_v6  ;;  %351 = vmatprep.mubr.f32.mxu0 %v2191_v2 }
  0x1f   :  { %364 = vmatprep.subr.mxu0 %v128_v12 }
  0x25   :  { %355 = vmatmul.mubr.f32.vlgmr.msra.gmra.mrb[0].mxu0 %v117_v14 }
  0x26   :  { %368 = vmatpush1.msra.mxu0 %v134_v13  ;;  %431 = vmatprep.mubr.f32.mxu0 %v2191_v2 }
  0x27   :  { %440 = vmatprep.subr.mxu0 %v48_v5  ;;  %v14_v5 = vld [vmem:[%s2644_s0 + $0x38] sm:$0xff] }
  0x28   :  { %18 = vst [vmem:[%s2646_s2 + $0x28] sm:$0xff] %v14_v5 }
  0x2d   :  { %433 = vmatmul.mubr.f32.vlgmr.msra.gmra.mrb[0].mxu0 %v2235_v8 }
  0x2e   :  { %442 = vmatpush1.msra.mxu0 %v50_v6  ;;  %505 = vmatprep.mubr.f32.mxu0 %v2191_v2  ;;  %v2379_v6 = vld [vmem:[%s2645_s1 + $0x18] sm:$0xff] }
  0x2f   :  { %1096 = vmatprep.subr.mxu0 %v1095_v22 }
  0x35   :  { %507 = vmatmul.mubr.f32.vlgmr.msra.gmra.mrb[0].mxu0 %v2235_v8 }
  0x36   :  { %1098 = vmatpush1.msra.mxu0 %v1097_v24  ;;  %1161 = vmatprep.mubr.f32.mxu0 %v2191_v2 }
  0x37   :  { %1178 = vmatprep.subr.mxu0 %v1177_v31  ;;  %v2429_v31 = vld [vmem:[%s2645_s1 + $0x40] sm:$0xff] }
  0x39   :  { %1167 = vmatmul.mubr.f32.vlgmr.msra.gmra.mrb[2].mxu0 %v119_v20 }
  0x3a   :  { %1184 = vmatpush1.msra.mxu0 %v1183_v32  ;;  %1247 = vmatprep.mubr.f32.mxu0 %v2191_v2  ;;  %v2434_v32 = vld [vmem:[%s2645_s1 + $0x48] sm:$0xff] }
  0x3b   :  { %1257 = vmatprep.subr.mxu0 %v1174_v25 }
  0x41   :  { %1249 = vmatmul.mubr.f32.vlgmr.msra.gmra.mrb[2].mxu0 %v2235_v8 }
  0x42   :  { %1260 = vmatpush1.msra.mxu0 %v1180_v26  ;;  %1323 = vmatprep.mubr.f32.mxu0 %v2191_v2 }
  0x43   :  { %1333 = vmatprep.subr.mxu0 %v1095_v22 }
  0x49   :  { %1326 = vmatmul.mubr.f32.vlgmr.msra.gmra.mrb[2].mxu0 %v116_v11 }
  0x4a   :  { %1335 = vmatpush1.msra.mxu0 %v1097_v24  ;;  %1398 = vmatprep.mubr.f32.mxu0 %v2191_v2 }
  0x4b   :  { %1411 = vmatprep.subr.mxu0 %v1175_v27 }
  0x51   :  { %1402 = vmatmul.mubr.f32.vlgmr.msra.gmra.mrb[2].mxu0 %v117_v14  ;;  %v2396_v14 = vld [vmem:[%s2645_s1 + $0x20] sm:$0xff] }
  0x52   :  { %1415 = vmatpush1.msra.mxu0 %v1181_v28  ;;  %1478 = vmatprep.mubr.f32.mxu0 %v2191_v2 }
  0x53   :  { %1487 = vmatprep.subr.mxu0 %v1095_v22  ;;  %v2413_v22 = vld [vmem:[%s2645_s1 + $0x30] sm:$0xff] }
  0x59   :  { %1480 = vmatmul.mubr.f32.vlgmr.msra.gmra.mrb[2].mxu0 %v2235_v8 }
  0x5a   :  { %1489 = vmatpush1.msra.mxu0 %v1097_v24  ;;  %1552 = vmatprep.mubr.f32.mxu0 %v2191_v2 }
  0x61   :  { %1554 = vmatmul.mubr.f32.vlgmr.msra.gmra.mrb[2].mxu0 %v2235_v8 }
  0x81   :  { %v43_v34 = vpop.permute.xlu0 %42 }
 0x108   :  { %v508_v35 = vpop.f32.mrb[0].mxu0 }
 0x109   :  { %v2126_v36 = vadd.f32 %v508_v35, %v43_v34  ;;  %v510_v37 = vpop.f32.mrb[1].mxu0 }
 0x10a   :  { %v2127_v39 = vadd.f32 %v510_v37, %v43_v34 }
 0x10b   :  { %v2261_v38 = vmax.f32 %v2126_v36, 0.0 }
 0x10c   :  { %v2271_v40 = vmax.f32 %v2127_v39, 0.0 }
 0x10d   :  { %526 = vrot.lane.b32.xlu1 %v2261_v38, %s2194_s19  ;;  %515 = vrot.lane.b32.xlu0 %v2261_v38, %s2195_s20  ;;  %v559_v39 = vmul.f32 %v2261_v38, %v2429_v31 }
 0x10e   :  { %v560_v37 = vmul.f32 %v2271_v40, %v2434_v32 }
 0x111   :  { %537 = vrot.lane.b32.xlu1 %v2261_v38, %s2196_s21  ;;  %596 = vrot.lane.b32.xlu0 %v2261_v38, %s2197_s22 }
 0x115   :  { %548 = vrot.lane.b32.xlu1 %v2261_v38, %s2198_s23  ;;  %528 = vrot.lane.b32.xlu0 %v2271_v40, %s2194_s19 }
 0x119   :  { %563 = vrot.lane.b32.xlu1 %v2261_v38, %s2199_s24  ;;  %539 = vrot.lane.b32.xlu0 %v2271_v40, %s2196_s21 }
 0x11d   :  { %517 = vrot.lane.b32.xlu1 %v2271_v40, %s2195_s20  ;;  %550 = vrot.lane.b32.xlu0 %v2271_v40, %s2198_s23 }
 0x121   :  { %574 = vrot.lane.b32.xlu1 %v2261_v38, %s2200_s25  ;;  %565 = vrot.lane.b32.xlu0 %v2271_v40, %s2199_s24 }
 0x125   :  { %585 = vrot.lane.b32.xlu1 %v2261_v38, %s2201_s26  ;;  %576 = vrot.lane.b32.xlu0 %v2271_v40, %s2200_s25 }
 0x129   :  { %608 = vperm.xlu1 %2188, %v2229_v3   ;;  %587 = vrot.lane.b32.xlu0 %v2271_v40, %s2201_s26 }
 0x12d   :  { %598 = vrot.lane.b32.xlu1 %v2271_v40, %s2197_s22  ;;  %619 = vrot.lane.b32.xlu0 %v2229_v3, %s2202_s27 }
 0x12e   :  { %2189 = vset.pattern.permute.xlu1 %v2203_v61 }
 0x134   :  { %v1555_v41 = vpop.f32.mrb[2].mxu0 }
 0x135   :  { %v2130_v42 = vadd.f32 %v1555_v41, %v43_v34  ;;  %v1557_v43 = vpop.f32.mrb[3].mxu0  ;;  %v2444_v41 = vld [vmem:[%s2645_s1 + $0x50] sm:$0xff] }
 0x136   :  { %v2131_v44 = vadd.f32 %v1557_v43, %v43_v34 }
 0x137   :  { %v2295_v45 = vmax.f32 %v2130_v42, 0.0  ;;  %v2449_v42 = vld [vmem:[%s2645_s1 + $0x58] sm:$0xff] }
 0x138   :  { %v2297_v46 = vmax.f32 %v2131_v44, 0.0 }
 0x139   :  { %1562 = vrot.lane.b32.xlu1 %v2295_v45, %s2195_s20 }
 0x13a   :  { %1564 = vrot.lane.b32.xlu0 %v2297_v46, %s2195_s20 }
 0x13d   :  { %1570 = vrot.lane.b32.xlu1 %v2295_v45, %s2194_s19 }
 0x13e   :  { %1572 = vrot.lane.b32.xlu0 %v2297_v46, %s2194_s19 }
 0x141   :  { %1580 = vrot.lane.b32.xlu1 %v2295_v45, %s2196_s21 }
 0x142   :  { %1582 = vrot.lane.b32.xlu0 %v2297_v46, %s2196_s21 }
 0x145   :  { %1590 = vrot.lane.b32.xlu1 %v2295_v45, %s2198_s23 }
 0x146   :  { %1592 = vrot.lane.b32.xlu0 %v2297_v46, %s2198_s23 }
 0x149   :  { %1604 = vrot.lane.b32.xlu1 %v2295_v45, %s2199_s24 }
 0x14a   :  { %1606 = vrot.lane.b32.xlu0 %v2297_v46, %s2199_s24 }
 0x14d   :  { %1614 = vrot.lane.b32.xlu1 %v2295_v45, %s2200_s25 }
 0x14e   :  { %1616 = vrot.lane.b32.xlu0 %v2297_v46, %s2200_s25 }
 0x151   :  { %1624 = vrot.lane.b32.xlu1 %v2295_v45, %s2201_s26 }
 0x152   :  { %1626 = vrot.lane.b32.xlu0 %v2297_v46, %s2201_s26 }
 0x155   :  { %1634 = vrot.lane.b32.xlu1 %v2295_v45, %s2197_s22 }
 0x156   :  { %1636 = vrot.lane.b32.xlu0 %v2297_v46, %s2197_s22 }
 0x159   :  { %616 = vperm.xlu1 %2189, %v2229_v3   ;;  %v2374_v3 = vld [vmem:[%s2645_s1 + $0x10] sm:$0xff] }
 0x17f   :  { %v527_v47 = vpop.permute.xlu1 %526  ;;  %v516_v48 = vpop.permute.xlu0 %515 }
 0x183   :  { %v538_v49 = vpop.permute.xlu1 %537  ;;  %v2327_v50 = vpop.permute.xlu0 %596 }
 0x187   :  { %v549_v52 = vpop.permute.xlu1 %548  ;;  %v529_v53 = vpop.permute.xlu0 %528 }
 0x188   :  { %v531_v7 = vsel %vm530_vm2, %v527_v47, %v529_v53  ;;  %v532_v8 = vsel %vm530_vm2, %v529_v53, %v527_v47  ;;  %v2465_v53 = vld [vmem:[%s2645_s1 + $0x60] sm:$0xff] }
 0x189   :  { %v533_v12 = vmul.f32 %v532_v8, %v2374_v3  ;;  %v534_v13 = vmul.f32 %v531_v7, %v2379_v6 }
 0x18b   :  { %v2331_v55 = vpop.permute.xlu1 %563  ;;  %v540_v56 = vpop.permute.xlu0 %539 }
 0x18c   :  { %v542_v16 = vsel %vm541_vm3, %v538_v49, %v540_v56  ;;  %v543_v17 = vsel %vm541_vm3, %v540_v56, %v538_v49 }
 0x18d   :  { %v544_v20 = vmul.f32 %v543_v17, %v2396_v14  ;;  %v545_v21 = vmul.f32 %v542_v16, %v2401_v15  ;;  %v2505_v16 = vld [vmem:[%s2645_s1 + $0x80] sm:$0xff]  ;;  %v2510_v17 = vld [vmem:[%s2645_s1 + $0x88] sm:$0xff] }
 0x18f   :  { %v518_v59 = vpop.permute.xlu1 %517  ;;  %v551_v60 = vpop.permute.xlu0 %550 }
 0x190   :  { %v522_v1 = vsel %vm521_vm1, %v516_v48, %v518_v59  ;;  %v523_v4 = vsel %vm521_vm1, %v518_v59, %v516_v48  ;;  %v553_v24 = vsel %vm552_vm4, %v549_v52, %v551_v60  ;;  %v554_v25 = vsel %vm552_vm4, %v551_v60, %v549_v52 }
 0x191   :  { %v524_v9 = vmul.f32 %v523_v4, %v2338_v57  ;;  %v525_v10 = vmul.f32 %v522_v1, %v2343_v58  ;;  %v555_v29 = vmul.f32 %v554_v25, %v2413_v22  ;;  %v556_v30 = vmul.f32 %v553_v24, %v2418_v23 }
 0x193   :  { %v566_v11 = vpop.permute.xlu0 %565  ;;  %v535_v18 = vadd.f32 %v533_v12, %v524_v9  ;;  %v536_v19 = vadd.f32 %v534_v13, %v525_v10  ;;  %v575_v35 = vpop.permute.xlu1 %574 }
 0x194   :  { %v568_v43 = vsel %vm567_vm5, %v2331_v55, %v566_v11  ;;  %v569_v40 = vsel %vm567_vm5, %v566_v11, %v2331_v55  ;;  %v2470_v55 = vld [vmem:[%s2645_s1 + $0x68] sm:$0xff] }
 0x195   :  { %v546_v27 = vadd.f32 %v544_v20, %v535_v18  ;;  %v547_v28 = vadd.f32 %v545_v21, %v536_v19  ;;  %v570_v48 = vmul.f32 %v568_v43, %v2444_v41  ;;  %v571_v49 = vmul.f32 %v569_v40, %v2449_v42 }
 0x197   :  { %v577_v26 = vpop.permute.xlu0 %576  ;;  %v557_v33 = vadd.f32 %v555_v29, %v546_v27  ;;  %v558_v34 = vadd.f32 %v556_v30, %v547_v28  ;;  %v586_v51 = vpop.permute.xlu1 %585 }
 0x198   :  { %v579_v56 = vsel %vm578_vm6, %v575_v35, %v577_v26  ;;  %v580_v59 = vsel %vm578_vm6, %v577_v26, %v575_v35 }
 0x199   :  { %v562_v44 = vadd.f32 %v560_v37, %v558_v34  ;;  %v561_v38 = vadd.f32 %v559_v39, %v557_v33  ;;  %v581_v5 = vmul.f32 %v579_v56, %v2465_v53  ;;  %v582_v7 = vmul.f32 %v580_v59, %v2470_v55 }
 0x19b   :  { %v588_v36 = vpop.permute.xlu0 %587  ;;  %v572_v60 = vadd.f32 %v570_v48, %v561_v38  ;;  %v573_v61 = vadd.f32 %v571_v49, %v562_v44 }
 0x19c   :  { %v590_v0 = vsel %vm589_vm7, %v586_v51, %v588_v36  ;;  %v591_v1 = vsel %vm589_vm7, %v588_v36, %v586_v51 }
 0x19d   :  { %v583_v9 = vadd.f32 %v581_v5, %v572_v60  ;;  %v584_v10 = vadd.f32 %v582_v7, %v573_v61  ;;  %v592_v11 = vmul.f32 %v590_v0, %v2479_v62  ;;  %v593_v12 = vmul.f32 %v591_v1, %v2484_v63 }
 0x19f   :  { %v620_v47 = vpop.permute.xlu0 %619  ;;  %v594_v24 = vadd.f32 %v592_v11, %v583_v9  ;;  %v595_v25 = vadd.f32 %v593_v12, %v584_v10 }
 0x1a0   :  { %v621_v52 = vsel %vm45_vm0, %v620_v47, 0 }
 0x1a1   :  { %v2490_v4 = vand.u32 4294901760, %v621_v52 }
 0x1a3   :  { %v2500_v13 = vsub.f32 %v621_v52, %v2490_v4 }
 0x1a5   :  { %v2521_v28 = vand.u32 4294901760, %v2500_v13 }
 0x1a8   :  { %v2494_v8 = vpop.permute.xlu1 %608 }
 0x1ac   :  { %v599_v18 = vpop.permute.xlu1 %598  ;;  %v1565_v19 = vpop.permute.xlu0 %1564 }
 0x1ad   :  { %v601_v20 = vsel %vm600_vm8, %v2327_v50, %v599_v18  ;;  %v602_v21 = vsel %vm600_vm8, %v599_v18, %v2327_v50  ;;  %v693_v50 = vsub.f32 %v2500_v13, %v2521_v28 }
 0x1ae   :  { %v603_v26 = vmul.f32 %v601_v20, %v2505_v16  ;;  %v604_v27 = vmul.f32 %v602_v21, %v2510_v17 }
 0x1af   :  { %v2535_v49 = vand.u32 4294901760, %v693_v50 }
 0x1b0   :  { %v605_v29 = vadd.f32 %v603_v26, %v594_v24  ;;  %v606_v30 = vadd.f32 %v604_v27, %v595_v25  ;;  %v1563_v33 = vpop.permute.xlu1 %1562  ;;  %v1573_v34 = vpop.permute.xlu0 %1572 }
 0x1b1   :  { %v1566_v51 = vsel %vm521_vm1, %v1563_v33, %v1565_v19  ;;  %v1567_v52 = vsel %vm521_vm1, %v1565_v19, %v1563_v33 }
 0x1b2   :  { %v611_v35 = vadd.f32 %v2494_v8, %v605_v29  ;;  %v612_v36 = vadd.f32 %v2494_v8, %v606_v30  ;;  %v1568_v11 = vmul.f32 %v1567_v52, %v2338_v57 }
 0x1b4   :  { %v613_v37 = vmax.f32 %v611_v35, 0.0  ;;  %v614_v39 = vmax.f32 %v612_v36, 0.0  ;;  %v1571_v43 = vpop.permute.xlu1 %1570  ;;  %v1583_v40 = vpop.permute.xlu0 %1582 }
 0x1b5   :  { %v1574_v44 = vsel %vm530_vm2, %v1571_v43, %v1573_v34  ;;  %v1575_v38 = vsel %vm530_vm2, %v1573_v34, %v1571_v43 }
 0x1b6   :  { %v2531_v47 = vand.u32 4294901760, %v614_v39  ;;  %v2533_v48 = vand.u32 4294901760, %v613_v37  ;;  %v1576_v0 = vmul.f32 %v1575_v38, %v2374_v3  ;;  %v1577_v1 = vmul.f32 %v1574_v44, %v2379_v6 }
 0x1b7   :  { %v1569_v3 = vmul.f32 %v1566_v51, %v2343_v58 }
 0x1b8   :  { %v1581_v56 = vpop.permute.xlu1 %1580  ;;  %624 = vmatprep.subr.mxu1 %v2531_v47  ;;  %v1593_v59 = vpop.permute.xlu0 %1592  ;;  %v2543_v60 = vsub.f32 %v614_v39, %v2531_v47  ;;  %v2546_v61 = vsub.f32 %v613_v37, %v2533_v48  ;;  %v1578_v24 = vadd.f32 %v1576_v0, %v1568_v11  ;;  %v1601_v37 = vmul.f32 %v2297_v46, %v2434_v32 }
 0x1b9   :  { %v1584_v5 = vsel %vm541_vm3, %v1581_v56, %v1583_v40  ;;  %v1585_v7 = vsel %vm541_vm3, %v1583_v40, %v1581_v56  ;;  %626 = vmatpush1.msra.mxu1 %v2533_v48  ;;  %v1579_v25 = vadd.f32 %v1577_v1, %v1569_v3 }
 0x1ba   :  { %695 = vmatmul.mubr.f32.vlgmr.msra.gmra.mrb[0].mxu1 %v2535_v49  ;;  %v703_v9 = vand.u32 4294901760, %v2543_v60  ;;  %v709_v10 = vand.u32 4294901760, %v2546_v61  ;;  %v1586_v6 = vmul.f32 %v1585_v7, %v2396_v14  ;;  %v1587_v12 = vmul.f32 %v1584_v5, %v2401_v15 }
 0x1bb   :  { %775 = vmatprep.mubr.f32.mxu1 %v2191_v2 }
 0x1bc   :  { %v1591_v18 = vpop.permute.xlu1 %1590  ;;  %v1607_v19 = vpop.permute.xlu0 %1606  ;;  %v704_v20 = vsub.f32 %v2543_v60, %v703_v9  ;;  %v710_v21 = vsub.f32 %v2546_v61, %v709_v10  ;;  %v1588_v29 = vadd.f32 %v1586_v6, %v1578_v24  ;;  %v1589_v30 = vadd.f32 %v1587_v12, %v1579_v25 }
 0x1bd   :  { %v1594_v57 = vsel %vm552_vm4, %v1591_v18, %v1593_v59  ;;  %v1595_v58 = vsel %vm552_vm4, %v1593_v59, %v1591_v18 }
 0x1be   :  { %v1596_v14 = vmul.f32 %v1595_v58, %v2413_v22  ;;  %v1597_v15 = vmul.f32 %v1594_v57, %v2418_v23  ;;  %v705_v26 = vand.u32 4294901760, %v704_v20  ;;  %v711_v27 = vand.u32 4294901760, %v710_v21 }
 0x1bf   :  { %v1600_v23 = vmul.f32 %v2295_v45, %v2429_v31 }
 0x1c0   :  { %v1605_v33 = vpop.permute.xlu1 %1604  ;;  %v1617_v34 = vpop.permute.xlu0 %1616  ;;  %706 = vmatprep.subr.mxu1 %v705_v26  ;;  %v1598_v35 = vadd.f32 %v1596_v14, %v1588_v29  ;;  %v1599_v36 = vadd.f32 %v1597_v15, %v1589_v30 }
 0x1c1   :  { %712 = vmatpush1.msra.mxu1 %v711_v27  ;;  %v1608_v50 = vsel %vm567_vm5, %v1605_v33, %v1607_v19  ;;  %v1609_v22 = vsel %vm567_vm5, %v1607_v19, %v1605_v33 }
 0x1c2   :  { %777 = vmatmul.mubr.f32.vlgmr.msra.gmra.mrb[0].mxu1 %v2490_v4  ;;  %785 = vmatprep.subr.mxu1 %v2543_v60  ;;  %v1602_v44 = vadd.f32 %v1600_v23, %v1598_v35  ;;  %v1603_v38 = vadd.f32 %v1601_v37, %v1599_v36  ;;  %v1610_v51 = vmul.f32 %v1608_v50, %v2444_v41 }
 0x1c3   :  { %851 = vmatprep.mubr.f32.mxu1 %v2191_v2  ;;  %788 = vmatpush1.msra.mxu1 %v2546_v61  ;;  %v1611_v45 = vmul.f32 %v1609_v22, %v2449_v42 }
 0x1c4   :  { %v1615_v39 = vpop.permute.xlu1 %1614  ;;  %861 = vmatprep.subr.mxu1 %v2531_v47  ;;  %v1627_v31 = vpop.permute.xlu0 %1626  ;;  %v1612_v60 = vadd.f32 %v1610_v51, %v1602_v44 }
 0x1c5   :  { %v1618_v43 = vsel %vm578_vm6, %v1615_v39, %v1617_v34  ;;  %v1619_v40 = vsel %vm578_vm6, %v1617_v34, %v1615_v39  ;;  %v1613_v0 = vadd.f32 %v1611_v45, %v1603_v38 }
 0x1c6   :  { %v1620_v46 = vmul.f32 %v1618_v43, %v2465_v53  ;;  %v1621_v32 = vmul.f32 %v1619_v40, %v2470_v55 }
 0x1c8   :  { %v1625_v52 = vpop.permute.xlu1 %1624  ;;  %v1622_v42 = vadd.f32 %v1620_v46, %v1612_v60  ;;  %v1623_v53 = vadd.f32 %v1621_v32, %v1613_v0  ;;  %v1637_v55 = vpop.permute.xlu0 %1636 }
 0x1c9   :  { %v1628_v56 = vsel %vm589_vm7, %v1625_v52, %v1627_v31  ;;  %v1629_v59 = vsel %vm589_vm7, %v1627_v31, %v1625_v52 }
 0x1ca   :  { %v1630_v1 = vmul.f32 %v1628_v56, %v2479_v62  ;;  %v1631_v41 = vmul.f32 %v1629_v59, %v2484_v63  ;;  %854 = vmatmul.mubr.f32.vlgmr.msra.gmra.mrb[0].mxu1 %v2500_v13 }
 0x1cb   :  { %863 = vmatpush1.msra.mxu1 %v2533_v48  ;;  %926 = vmatprep.mubr.f32.mxu1 %v2191_v2 }
 0x1cc   :  { %939 = vmatprep.subr.mxu1 %v703_v9  ;;  %v1635_v5 = vpop.permute.xlu1 %1634  ;;  %v1632_v62 = vadd.f32 %v1630_v1, %v1622_v42  ;;  %v1633_v3 = vadd.f32 %v1631_v41, %v1623_v53 }
 0x1cd   :  { %v1638_v7 = vsel %vm600_vm8, %v1635_v5, %v1637_v55  ;;  %v1639_v11 = vsel %vm600_vm8, %v1637_v55, %v1635_v5 }
 0x1ce   :  { %v1640_v63 = vmul.f32 %v1638_v7, %v2505_v16  ;;  %v1641_v6 = vmul.f32 %v1639_v11, %v2510_v17 }
 0x1d0   :  { %v1642_v12 = vadd.f32 %v1640_v63, %v1632_v62  ;;  %v1643_v18 = vadd.f32 %v1641_v6, %v1633_v3 }
 0x1d2   :  { %v1644_v19 = vadd.f32 %v1642_v12, %v2494_v8  ;;  %v1645_v20 = vadd.f32 %v1643_v18, %v2494_v8  ;;  %930 = vmatmul.mubr.f32.vlgmr.msra.gmra.mrb[0].mxu1 %v2521_v28 }
 0x1d3   :  { %943 = vmatpush1.msra.mxu1 %v709_v10  ;;  %1006 = vmatprep.mubr.f32.mxu1 %v2191_v2 }
 0x1d4   :  { %v1646_v54 = vmax.f32 %v1644_v19, 0.0  ;;  %v1647_v9 = vmax.f32 %v1645_v20, 0.0  ;;  %1015 = vmatprep.subr.mxu1 %v2531_v47 }
 0x1d6   :  { %v1648_v16 = vand.u32 4294901760, %v1647_v9  ;;  %v1650_v21 = vand.u32 4294901760, %v1646_v54 }
 0x1d8   :  { %v1727_v17 = vsub.f32 %v1647_v9, %v1648_v16  ;;  %v1733_v24 = vsub.f32 %v1646_v54, %v1650_v21 }
 0x1da   :  { %1008 = vmatmul.mubr.f32.vlgmr.msra.gmra.mrb[0].mxu1 %v2490_v4  ;;  %v1728_v25 = vand.u32 4294901760, %v1727_v17  ;;  %v1734_v8 = vand.u32 4294901760, %v1733_v24 }
 0x1db   :  { %1017 = vmatpush1.msra.mxu1 %v2533_v48  ;;  %1080 = vmatprep.mubr.f32.mxu1 %v2191_v2  ;;  %v617_v48 = vpop.permute.xlu1 %616 }
 0x1dc   :  { %1649 = vmatprep.subr.mxu1 %v1648_v16  ;;  %v1729_v61 = vsub.f32 %v1727_v17, %v1728_v25  ;;  %v1735_v10 = vsub.f32 %v1733_v24, %v1734_v8 }
 0x1de   :  { %v1730_v57 = vand.u32 4294901760, %v1729_v61  ;;  %v1736_v47 = vand.u32 4294901760, %v1735_v10 }
 0x1e2   :  { %1082 = vmatmul.mubr.f32.vlgmr.msra.gmra.mrb[0].mxu1 %v2490_v4 }
 0x1e3   :  { %1651 = vmatpush1.msra.mxu1 %v1650_v21  ;;  %1714 = vmatprep.mubr.f32.mxu1 %v2191_v2 }
 0x1e4   :  { %1731 = vmatprep.subr.mxu1 %v1730_v57 }
 0x1e6   :  { %1720 = vmatmul.mubr.f32.vlgmr.msra.gmra.mrb[2].mxu1 %v2535_v49 }
 0x1e7   :  { %1737 = vmatpush1.msra.mxu1 %v1736_v47  ;;  %1800 = vmatprep.mubr.f32.mxu1 %v2191_v2 }
 0x1e8   :  { %1810 = vmatprep.subr.mxu1 %v1727_v17 }
 0x1ee   :  { %1802 = vmatmul.mubr.f32.vlgmr.msra.gmra.mrb[2].mxu1 %v2490_v4 }
 0x1ef   :  { %1813 = vmatpush1.msra.mxu1 %v1733_v24  ;;  %1876 = vmatprep.mubr.f32.mxu1 %v2191_v2 }
 0x1f0   :  { %1886 = vmatprep.subr.mxu1 %v1648_v16 }
 0x1f6   :  { %1879 = vmatmul.mubr.f32.vlgmr.msra.gmra.mrb[2].mxu1 %v2500_v13 }
 0x1f7   :  { %1888 = vmatpush1.msra.mxu1 %v1650_v21  ;;  %1951 = vmatprep.mubr.f32.mxu1 %v2191_v2 }
 0x1f8   :  { %1964 = vmatprep.subr.mxu1 %v1728_v25 }
 0x1fe   :  { %1955 = vmatmul.mubr.f32.vlgmr.msra.gmra.mrb[2].mxu1 %v2521_v28 }
 0x1ff   :  { %1968 = vmatpush1.msra.mxu1 %v1734_v8  ;;  %2031 = vmatprep.mubr.f32.mxu1 %v2191_v2 }
 0x200   :  { %2040 = vmatprep.subr.mxu1 %v1648_v16 }
 0x206   :  { %2033 = vmatmul.mubr.f32.vlgmr.msra.gmra.mrb[2].mxu1 %v2490_v4 }
 0x207   :  { %2042 = vmatpush1.msra.mxu1 %v1650_v21  ;;  %2105 = vmatprep.mubr.f32.mxu1 %v2191_v2 }
 0x20e   :  { %2107 = vmatmul.mubr.f32.vlgmr.msra.gmra.mrb[2].mxu1 %v2490_v4 }
 0x2b5   :  { %v1083_v49 = vpop.f32.mrb[0].mxu1 }
 0x2b6   :  { %v2128_v13 = vadd.f32 %v1083_v49, %v617_v48  ;;  %v1085_v58 = vpop.f32.mrb[1].mxu1 }
 0x2b7   :  { %v2129_v14 = vadd.f32 %v1085_v58, %v617_v48 }
 0x2b8   :  { %v1088_v15 = vmax.f32 %v2128_v13, 0.0 }
 0x2b9   :  { %v1089_v26 = vmax.f32 %v2129_v14, 0.0 }
 0x2ba   :  { %1090 = vst [vmem:[%s2646_s2 + $0x10] sm:$0xff] %v1088_v15 }
 0x2bb   :  { %1091 = vst [vmem:[%s2646_s2 + $0x18] sm:$0xff] %v1089_v26 }
 0x2e1   :  { %v2108_v28 = vpop.f32.mrb[2].mxu1 }
 0x2e2   :  { %v2132_v27 = vadd.f32 %v2108_v28, %v617_v48  ;;  %v2110_v2 = vpop.f32.mrb[3].mxu1 }
 0x2e3   :  { %v2133_v29 = vadd.f32 %v2110_v2, %v617_v48 }
 0x2e4   :  { %v2113_v4 = vmax.f32 %v2132_v27, 0.0 }
 0x2e5   :  { %v2114_v30 = vmax.f32 %v2133_v29, 0.0 }
 0x2e6   :  { %2124 = vst [vmem:[%s2646_s2 + $0x30] sm:$0xff] %v2113_v4 }
 0x2e7   :  { %2125 = vst [vmem:[%s2646_s2 + $0x38] sm:$0xff] %v2114_v30 }

</bundles_post_ra>
